<compile_context>
chip_gen: v5e
topology: v5e:2x2
jax: 0.10.0
libtpu: 0.0.40
codegen_flags: <defaults>
</compile_context>

<pallas_src>
from functools import partial

import jax
import jax.numpy as jnp
import numpy as np
from jax.experimental import pallas as pl
from jax.experimental.pallas import tpu as pltpu


# ----------------------------------------------------------------------------
# Fused Pallas kernel (one grid step = one batch element)
# ----------------------------------------------------------------------------
def _temporal_block_kernel(*refs, ksize, dilation, padding, length,
                           downsample):
    # refs: x_ref (Cin, L), w1_ref (Cout, K*Cin+1), w2_ref (Cout, K*Cout+1),
    #       [wd_ref (Cout, Cin+1)], o_ref (Cout, L)   (batch dim squeezed)
    if downsample:
        x_ref, w1_ref, w2_ref, wd_ref, o_ref = refs
    else:
        x_ref, w1_ref, w2_ref, o_ref = refs
        wd_ref = None

    def conv_relu(h, w_aug):
        # h: (C, Lh) f32 in VMEM; w_aug: (Cout, K*C+1) with bias as last column.
        c, lh = h.shape
        p = padding
        # circular pad on the VMEM-resident tile (PyTorch 'circular' mode)
        hp = jnp.concatenate([h[:, lh - p:], h, h[:, :p]], axis=1)  # (C, Lh+2p)
        lout = lh + 2 * p - dilation * (ksize - 1)
        # collapse the K dilation taps into one MXU contraction operand
        taps = [hp[:, k * dilation:k * dilation + lout] for k in range(ksize)]
        taps.append(jnp.ones((1, lout), jnp.float32))               # bias row
        g = jnp.concatenate(taps, axis=0)                           # (K*C+1, Lout)
        out = jnp.dot(w_aug, g, preferred_element_type=jnp.float32)  # MXU
        return jnp.maximum(out, 0.0)                                 # ReLU

    x = x_ref[...].astype(jnp.float32)                               # (Cin, L)

    h1 = conv_relu(x, w1_ref[...].astype(jnp.float32))               # conv1+ReLU
    h2 = conv_relu(h1, w2_ref[...].astype(jnp.float32))              # conv2+ReLU

    # centre-crop back to input length: out[:, :, idx:idx+L] in PyTorch
    idx = (h2.shape[1] - length) // 2
    out = h2[:, idx:idx + length]                                    # (Cout, L)

    # residual branch
    if downsample:
        xa = jnp.concatenate([x, jnp.ones((1, length), jnp.float32)], axis=0)
        res = jnp.dot(wd_ref[...].astype(jnp.float32), xa,
                      preferred_element_type=jnp.float32)            # (Cout, L)
    else:
        res = x

    o_ref[...] = jnp.maximum(out + res, 0.0).astype(o_ref.dtype)


# ----------------------------------------------------------------------------
# Parameter preparation (run once per parameter update, not per forward)
# ----------------------------------------------------------------------------
def apply_weight_norm(v, g):
    """v: (Cout, Cin, K), g: (Cout,) -> W = g * v / ||v|| (norm over (Cin, K))."""
    norm = jnp.sqrt(jnp.sum(v * v, axis=(1, 2), keepdims=True))
    return g.reshape(-1, 1, 1) * v / norm


def prepare_temporal_block_params(params):
    """weight_norm reparam + tap-merged layout + bias folding, done once."""
    def fold(v, g, b):
        w = apply_weight_norm(v, g)                        # (Cout, Cin, K)
        cout = w.shape[0]
        w = jnp.transpose(w, (0, 2, 1)).reshape(cout, -1)  # (Cout, K*Cin)
        return jnp.concatenate([w, b[:, None]], axis=1)    # (Cout, K*Cin+1)

    prepared = {
        "w1": fold(params["v1"], params["g1"], params["b1"]),
        "w2": fold(params["v2"], params["g2"], params["b2"]),
        "wd": None,
    }
    if params.get("wd") is not None:
        prepared["wd"] = jnp.concatenate(
            [params["wd"][:, :, 0], params["bd"][:, None]], axis=1)  # (Cout, Cin+1)
    return prepared


# ----------------------------------------------------------------------------
# Forward wrapper
# ----------------------------------------------------------------------------
def temporal_block_forward(x_ncl, prepared, *, kernel_size, dilation, padding):
    """x_ncl: (N, Cin, L) -> (N, Cout, L), matching TemporalBlock.forward."""
    n, cin, l = x_ncl.shape
    cout = prepared["w1"].shape[0]
    downsample = prepared["wd"] is not None

    # PyTorch circular padding requires padding <= length (both convs).
    assert padding <= l, "circular padding must be <= input length"
    lout1 = l + 2 * padding - dilation * (kernel_size - 1)
    assert padding <= lout1, "circular padding must be <= conv1 output length"

    kern = partial(_temporal_block_kernel, ksize=kernel_size,
                   dilation=dilation, padding=padding, length=l,
                   downsample=downsample)

    in_arrays = [x_ncl, prepared["w1"], prepared["w2"]]
    in_specs = [
        pl.BlockSpec((None, cin, l), lambda b: (b, 0, 0)),       # batch squeezed
        pl.BlockSpec(prepared["w1"].shape, lambda b: (0, 0)),    # resident
        pl.BlockSpec(prepared["w2"].shape, lambda b: (0, 0)),    # resident
    ]
    if downsample:
        in_arrays.append(prepared["wd"])
        in_specs.append(pl.BlockSpec(prepared["wd"].shape, lambda b: (0, 0)))

    # NOTE: for long sequences an additional L-tile "parallel" grid axis (with
    # circular-halo handling) would be added; at TCN-sized channels / lengths a
    # single fused step per batch element fits comfortably in VMEM.
    return pl.pallas_call(
        kern,
        out_shape=jax.ShapeDtypeStruct((n, cout, l), x_ncl.dtype),
        grid=(n,),
        in_specs=in_specs,
        out_specs=pl.BlockSpec((None, cout, l), lambda b: (b, 0, 0)),
        compiler_params=pltpu.CompilerParams(
            dimension_semantics=("parallel",)),
    )(*in_arrays)


# ----------------------------------------------------------------------------
# float64 NumPy reference (ground truth, host-side) for a sanity check
# ----------------------------------------------------------------------------
def _ref_forward_np(x, params, *, kernel_size, dilation, padding):
    p, d, k = padding, dilation, kernel_size
    x = np.asarray(x, np.float64)

    def wnorm(v, g):
        v = np.asarray(v, np.float64)
        g = np.asarray(g, np.float64)
        nrm = np.sqrt((v * v).sum(axis=(1, 2), keepdims=True))
        return g.reshape(-1, 1, 1) * v / nrm

    def conv(h, w, b):                      # h: (N, C, L), w: (Cout, C, K)
        n, c, l = h.shape
        hp = np.concatenate([h[:, :, l - p:], h, h[:, :, :p]], axis=2)
        lout = l + 2 * p - d * (k - 1)
        acc = np.zeros((n, w.shape[0], lout), np.float64)
        for kk in range(k):
            acc += np.einsum("nct,oc->not",
                             hp[:, :, kk * d:kk * d + lout], w[:, :, kk])
        return acc + np.asarray(b, np.float64)[None, :, None]

    out = np.maximum(conv(x, wnorm(params["v1"], params["g1"]),
                          params["b1"]), 0.0)
    out = np.maximum(conv(out, wnorm(params["v2"], params["g2"]),
                          params["b2"]), 0.0)
    l = x.shape[2]
    idx = (out.shape[2] - l) // 2
    out = out[:, :, idx:idx + l]

    if params.get("wd") is not None:
        res = np.einsum("ncl,oc->nol", x,
                        np.asarray(params["wd"], np.float64)[:, :, 0]) \
            + np.asarray(params["bd"], np.float64)[None, :, None]
    else:
        res = x
    return np.maximum(out + res, 0.0)


# ----------------------------------------------------------------------------
if __name__ == "__main__":
    # Module config: TemporalBlock(n_inputs=4, n_outputs=8, kernel_size=3,
    #                              stride=1, dilation=2, padding=4,
    #                              dropout=0.2, padding_mode='circular')
    N, C_IN, C_OUT, L = 2, 4, 8, 16
    K, DIL = 3, 2
    PAD = (K - 1) * DIL  # 4

    key = jax.random.PRNGKey(0)
    k1, k2, k3, k4, k5, k6, kx = jax.random.split(key, 7)

    params = {
        # weight_norm parametrisation: v (direction), g (per-out-channel gain)
        "v1": 0.01 * jax.random.normal(k1, (C_OUT, C_IN, K), jnp.float32),
        "b1": 0.01 * jax.random.normal(k2, (C_OUT,), jnp.float32),
        "v2": 0.01 * jax.random.normal(k3, (C_OUT, C_OUT, K), jnp.float32),
        "b2": 0.01 * jax.random.normal(k4, (C_OUT,), jnp.float32),
        # downsample 1x1 conv (present because n_inputs != n_outputs)
        "wd": 0.01 * jax.random.normal(k5, (C_OUT, C_IN, 1), jnp.float32),
        "bd": 0.01 * jax.random.normal(k6, (C_OUT,), jnp.float32),
    }
    params["g1"] = jnp.sqrt(jnp.sum(params["v1"] ** 2, axis=(1, 2)))
    params["g2"] = jnp.sqrt(jnp.sum(params["v2"] ** 2, axis=(1, 2)))

    x = jax.random.normal(kx, (N, C_IN, L), jnp.float32)   # NCL, like PyTorch

    # Hoisted out of the per-forward path: weight-norm + layout + bias folding.
    prepared = prepare_temporal_block_params(params)

    fwd = jax.jit(partial(temporal_block_forward, kernel_size=K,
                          dilation=DIL, padding=PAD))
    y = fwd(x, prepared)
    jax.block_until_ready(y)

    y_ref = _ref_forward_np(x, params, kernel_size=K, dilation=DIL, padding=PAD)
    assert y.shape == (N, C_OUT, L), y.shape
    max_err = float(np.max(np.abs(np.asarray(y, np.float64) - y_ref)))
    # MXU matmuls may round operands to bf16 at default precision; allow that.
    assert max_err < 5e-3, f"mismatch vs reference, max abs err = {max_err}"

    print("KERNEL_OK")
</pallas_src>

<mosaic_0001>
module attributes {stable_mosaic.version = 11 : i64} {
  func.func @_temporal_block_kernel(%arg0: i32, %arg1: memref<1x4x16xf32, #tpu.memory_space<vmem>>, %arg2: memref<8x13xf32, #tpu.memory_space<vmem>>, %arg3: memref<8x25xf32, #tpu.memory_space<vmem>>, %arg4: memref<8x5xf32, #tpu.memory_space<vmem>>, %arg5: memref<1x8x16xf32, #tpu.memory_space<vmem>>) attributes {dimension_semantics = [#tpu.dimension_semantics<parallel>], iteration_bounds = array<i64: 2>, scalar_prefetch = 0 : i64, scratch_operands = 0 : i64, tpu.core_type = #tpu.core_type<tc>, window_params = [{transform_indices = @transform_0, window_bounds = array<i64: 1, 4, 16>}, {pipeline_mode = #tpu.pipeline_mode<synchronous>, transform_indices = @transform_1, window_bounds = array<i64: 8, 13>}, {pipeline_mode = #tpu.pipeline_mode<synchronous>, transform_indices = @transform_2, window_bounds = array<i64: 8, 25>}, {pipeline_mode = #tpu.pipeline_mode<synchronous>, transform_indices = @transform_3, window_bounds = array<i64: 8, 5>}, {transform_indices = @transform_4, window_bounds = array<i64: 1, 8, 16>}]} {
    %c0 = arith.constant 0 : index
    %c0_0 = arith.constant 0 : index
    %c0_1 = arith.constant 0 : index
    %0 = vector.load %arg1[%c0, %c0_0, %c0_1] : memref<1x4x16xf32, #tpu.memory_space<vmem>>, vector<1x4x16xf32>
    %1 = vector.shape_cast %0 : vector<1x4x16xf32> to vector<4x16xf32>
    %c0_2 = arith.constant 0 : index
    %c0_3 = arith.constant 0 : index
    %2 = vector.load %arg2[%c0_2, %c0_3] : memref<8x13xf32, #tpu.memory_space<vmem>>, vector<8x13xf32>
    %3 = vector.extract_strided_slice %1 {offsets = [0, 12], sizes = [4, 4], strides = [1, 1]} : vector<4x16xf32> to vector<4x4xf32>
    %4 = vector.extract_strided_slice %1 {offsets = [0, 0], sizes = [4, 4], strides = [1, 1]} : vector<4x16xf32> to vector<4x4xf32>
    %5 = tpu.concatenate %3, %1, %4 in 1 : vector<4x4xf32>, vector<4x16xf32>, vector<4x4xf32> -> vector<4x24xf32>
    %6 = vector.extract_strided_slice %5 {offsets = [0, 0], sizes = [4, 20], strides = [1, 1]} : vector<4x24xf32> to vector<4x20xf32>
    %7 = vector.extract_strided_slice %5 {offsets = [0, 2], sizes = [4, 20], strides = [1, 1]} : vector<4x24xf32> to vector<4x20xf32>
    %8 = vector.extract_strided_slice %5 {offsets = [0, 4], sizes = [4, 20], strides = [1, 1]} : vector<4x24xf32> to vector<4x20xf32>
    %cst = arith.constant 1.000000e+00 : f32
    %9 = vector.broadcast %cst : f32 to vector<1x20xf32>
    %10 = tpu.concatenate %6, %7, %8, %9 in 0 : vector<4x20xf32>, vector<4x20xf32>, vector<4x20xf32>, vector<1x20xf32> -> vector<13x20xf32>
    %cst_4 = arith.constant dense<0.000000e+00> : vector<8x20xf32>
    %11 = tpu.matmul %2, %10, %cst_4 {dimension_numbers = #tpu.dot_dimension_numbers<[1], [0], [0], [1], [0, 0, 1, 1], [], []>} : vector<8x13xf32>, vector<13x20xf32>, vector<8x20xf32> -> vector<8x20xf32>
    %cst_5 = arith.constant 0.000000e+00 : f32
    %12 = vector.broadcast %cst_5 : f32 to vector<8x20xf32>
    %13 = arith.maximumf %11, %12 : vector<8x20xf32>
    %c0_6 = arith.constant 0 : index
    %c0_7 = arith.constant 0 : index
    %14 = vector.load %arg3[%c0_6, %c0_7] : memref<8x25xf32, #tpu.memory_space<vmem>>, vector<8x25xf32>
    %15 = vector.extract_strided_slice %13 {offsets = [0, 16], sizes = [8, 4], strides = [1, 1]} : vector<8x20xf32> to vector<8x4xf32>
    %16 = vector.extract_strided_slice %13 {offsets = [0, 0], sizes = [8, 4], strides = [1, 1]} : vector<8x20xf32> to vector<8x4xf32>
    %17 = tpu.concatenate %15, %13, %16 in 1 : vector<8x4xf32>, vector<8x20xf32>, vector<8x4xf32> -> vector<8x28xf32>
    %18 = vector.extract_strided_slice %17 {offsets = [0, 0], sizes = [8, 24], strides = [1, 1]} : vector<8x28xf32> to vector<8x24xf32>
    %19 = vector.extract_strided_slice %17 {offsets = [0, 2], sizes = [8, 24], strides = [1, 1]} : vector<8x28xf32> to vector<8x24xf32>
    %20 = vector.extract_strided_slice %17 {offsets = [0, 4], sizes = [8, 24], strides = [1, 1]} : vector<8x28xf32> to vector<8x24xf32>
    %cst_8 = arith.constant 1.000000e+00 : f32
    %21 = vector.broadcast %cst_8 : f32 to vector<1x24xf32>
    %22 = tpu.concatenate %18, %19, %20, %21 in 0 : vector<8x24xf32>, vector<8x24xf32>, vector<8x24xf32>, vector<1x24xf32> -> vector<25x24xf32>
    %cst_9 = arith.constant dense<0.000000e+00> : vector<8x24xf32>
    %23 = tpu.matmul %14, %22, %cst_9 {dimension_numbers = #tpu.dot_dimension_numbers<[1], [0], [0], [1], [0, 0, 1, 1], [], []>} : vector<8x25xf32>, vector<25x24xf32>, vector<8x24xf32> -> vector<8x24xf32>
    %cst_10 = arith.constant 0.000000e+00 : f32
    %24 = vector.broadcast %cst_10 : f32 to vector<8x24xf32>
    %25 = arith.maximumf %23, %24 : vector<8x24xf32>
    %26 = vector.extract_strided_slice %25 {offsets = [0, 4], sizes = [8, 16], strides = [1, 1]} : vector<8x24xf32> to vector<8x16xf32>
    %cst_11 = arith.constant 1.000000e+00 : f32
    %27 = vector.broadcast %cst_11 : f32 to vector<1x16xf32>
    %28 = tpu.concatenate %1, %27 in 0 : vector<4x16xf32>, vector<1x16xf32> -> vector<5x16xf32>
    %c0_12 = arith.constant 0 : index
    %c0_13 = arith.constant 0 : index
    %29 = vector.load %arg4[%c0_12, %c0_13] : memref<8x5xf32, #tpu.memory_space<vmem>>, vector<8x5xf32>
    %cst_14 = arith.constant dense<0.000000e+00> : vector<8x16xf32>
    %30 = tpu.matmul %29, %28, %cst_14 {dimension_numbers = #tpu.dot_dimension_numbers<[1], [0], [0], [1], [0, 0, 1, 1], [], []>} : vector<8x5xf32>, vector<5x16xf32>, vector<8x16xf32> -> vector<8x16xf32>
    %31 = arith.addf %26, %30 : vector<8x16xf32>
    %cst_15 = arith.constant 0.000000e+00 : f32
    %32 = vector.broadcast %cst_15 : f32 to vector<8x16xf32>
    %33 = arith.maximumf %31, %32 : vector<8x16xf32>
    %c0_16 = arith.constant 0 : index
    %c0_17 = arith.constant 0 : index
    %c0_18 = arith.constant 0 : index
    %34 = vector.load %arg5[%c0_16, %c0_17, %c0_18] : memref<1x8x16xf32, #tpu.memory_space<vmem>>, vector<1x8x16xf32>
    %35 = vector.shape_cast %34 : vector<1x8x16xf32> to vector<8x16xf32>
    %36 = vector.shape_cast %33 : vector<8x16xf32> to vector<1x8x16xf32>
    tpu.vector_store %arg5[%c0_16, %c0_17, %c0_18], %36 {strides = array<i32>} : memref<1x8x16xf32, #tpu.memory_space<vmem>>, vector<1x8x16xf32>,
    return
  }
  func.func @transform_0(%arg0: i32) -> (i32, i32, i32) {
    %c0_i32 = arith.constant 0 : i32
    %c0_i32_0 = arith.constant 0 : i32
    %c0_i32_1 = arith.constant 0 : i32
    return %arg0, %c0_i32, %c0_i32_0 : i32, i32, i32
  }
  func.func @transform_1(%arg0: i32) -> (i32, i32) {
    %c0_i32 = arith.constant 0 : i32
    %c0_i32_0 = arith.constant 0 : i32
    %c0_i32_1 = arith.constant 0 : i32
    return %c0_i32, %c0_i32_0 : i32, i32
  }
  func.func @transform_2(%arg0: i32) -> (i32, i32) {
    %c0_i32 = arith.constant 0 : i32
    %c0_i32_0 = arith.constant 0 : i32
    %c0_i32_1 = arith.constant 0 : i32
    return %c0_i32, %c0_i32_0 : i32, i32
  }
  func.func @transform_3(%arg0: i32) -> (i32, i32) {
    %c0_i32 = arith.constant 0 : i32
    %c0_i32_0 = arith.constant 0 : i32
    %c0_i32_1 = arith.constant 0 : i32
    return %c0_i32, %c0_i32_0 : i32, i32
  }
  func.func @transform_4(%arg0: i32) -> (i32, i32, i32) {
    %c0_i32 = arith.constant 0 : i32
    %c0_i32_0 = arith.constant 0 : i32
    %c0_i32_1 = arith.constant 0 : i32
    return %arg0, %c0_i32, %c0_i32_0 : i32, i32, i32
  }
}

</mosaic_0001>

<bundles_post_ra>
// kernel: temporal_block_forward.1
= control target key start
LH: loop header
LB: loop body
LE: loop exit
PB: predicated region body
PF: predicated region fallthrough
CT: control target
= control target key end

     0   :  { %9 = vsyncpa [#allocation3], 0  ;;  %s1023_s0 = inlined_call_operand.hbm [shape: f32[2,4,16], index: 0, kind: input, shape index: {}]   ;;  %s1024_s1 = inlined_call_operand.hbm [shape: f32[8,13], index: 1, kind: input, shape index: {}]   ;;  %s1025_s2 = inlined_call_operand.hbm [shape: f32[8,25], index: 2, kind: input, shape index: {}]   ;;  %s1026_s3 = inlined_call_operand.hbm [shape: f32[8,5], index: 3, kind: input, shape index: {}]   ;;  %s1027_s4 = inlined_call_operand.hbm [shape: f32[2,8,16], index: 4, kind: output, shape index: {}]  }
   0x1   :  { %11 = vsyncpa [#allocation3 + $0x1], 0 }
   0x2   :  { %12 = vsyncpa [#allocation6], 0 }
   0x3   :  { %13 = vsyncpa [#allocation9], 0 }
   0x4   :  { %14 = vsyncpa [#allocation4], 0 }
   0x5   :  { %16 = vsyncpa [#allocation4 + $0x1], 0  ;;  %s862_s15 = smov 0   ;;  %s864_s16 = smov 0  }
   0x6   :  { %s866_s17 = smov 0   ;;  %s868_s18 = smov 0  }
   0x7 LB: > { %s883_s19 = sadd.s32 4294967295, %s824_s18   ;;  %s521_s20 = sadd.s32 4294967294, %s824_s18   ;;  %s824_s18 = sphi %s868_s18, %s1037_s18   ;;  %s820_s17 = sphi %s866_s17, %s1036_s17   ;;  %s816_s16 = sphi %s864_s16, %s1035_s16   ;;  %s812_s15 = sphi %s862_s15, %s1034_s15  }
   0x8   : > { %p42_p0 = scmp.ne.s32.totalorder %s816_s16, %s812_s15  ;;  %p43_p1 = scmp.eq.s32.totalorder %s883_s19, 0 }
   0x9   : > { %p129_p2 = scmp.eq.s32.totalorder %s883_s19, 1  ;;  %p135_p3 = scmp.eq.s32.totalorder %s521_s20, 1 }
   0xa   : > { %p892_p4 = por %p43_p1, %p42_p0  ;;  %p522_p5 = scmp.ge.s32.totalorder %s824_s18, 1 }
   0xb   : > { %p897_p6 = por %p135_p3, %p42_p0  ;;  %p142_p7 = scmp.lt.s32.totalorder %s824_s18, 3 }
   0xc   : > { %s154_s25 = sshll.u32 %s1024_s1, 4  ;;  %s826_s27 = smov [#allocation5]   ;;  %s155_s25 = int_to_ptr.hbm [resolvable:$true] %s154_s25 }
   0xd   : > { %p905_p8 = pnand %p522_p5, %p142_p7  ;;  %s156_s28 = sshll.u32 %s826_s27, 4  ;;  %s157_s28 = int_to_ptr.vmem [resolvable:$true] %s156_s28 }
   0xe   : > { %s166_s5 = sshll.u32 %s1025_s2, 4  ;;  %s178_s8 = sshll.u32 %s1026_s3, 4  ;;  %s167_s5 = int_to_ptr.hbm [resolvable:$true] %s166_s5  ;;  %s179_s8 = int_to_ptr.hbm [resolvable:$true] %s178_s8 }
   0xf   : > { %p561_p10 = pneg %p905_p8  ;;  %s827_s9 = smov [#allocation7]  }
  0x10   : > { %s168_s10 = sshll.u32 %s827_s9, 4  ;;  %s828_s11 = smov [#allocation8]   ;;  %s169_s10 = int_to_ptr.vmem [resolvable:$true] %s168_s10 }
  0x11   : > { %p562_p11 = pnand %p561_p10, %p43_p1  ;;  %s180_s12 = sshll.u32 %s828_s11, 4  ;;  %s181_s12 = int_to_ptr.vmem [resolvable:$true] %s180_s12 }
  0x12   : > { %s921_s13 = sadd.s32 1, %s824_s18   ;;  %s29_s20 = sadd.s32 1, %s820_s17 }
  0x13   : > { %564 = dma.hbm_to_vmem [thread:$0]  (!%p562_p11), %s155_s25, 128, %s157_s28, [#allocation6]  }
  0x14   : > { %567 = dma.hbm_to_vmem [thread:$0]  (!%p562_p11), %s167_s5, 128, %s169_s10, [#allocation6]  }
  0x15   : > { %570 = dma.hbm_to_vmem [thread:$0]  (!%p562_p11), %s179_s8, 128, %s181_s12, [#allocation9]  }
  0x16   : > { %s26_s14 = ssub.s32 %s824_s18, %s921_s13  ;;  %p36_p13 = scmp.ne.s32.totalorder %s820_s17, %s816_s16 }
  0x17   : > { %p27_p12 = scmp.eq.s32.totalorder %s26_s14, 0  ;;  %p37_p0 = scmp.eq.s32.totalorder %s824_s18, 0 }
  0x18   : > { %p934_p3 = por %p129_p2, %p36_p13  ;;  %p582_p5 = scmp.lt.s32.totalorder %s824_s18, 2 }
  0x19   : > { %s930_s23 = scalar_select %p27_p12, %s820_s17, %s29_s20  }
  0x1a   : > { %s191_s25 = sand.u32 1, %s820_s17   ;;  %s528_s27 = sshll.u32 %s824_s18, 2 }
  0x1b   : > { %p38_p7 = por %p37_p0, %p36_p13  ;;  %s527_s28 = sshll.u32 %s191_s25, 2 }
  0x1c   : > { %s199_s5 = scalar_lea.hbm %s1023_s0, %s528_s27  ;;  %s195_s7 = scalar_lea.vmem [#allocation2], %s527_s28 }
  0x1d   : > { %s201_s6 = sshll.u32 %s199_s5, 4  ;;  %s203_s8 = sshll.u32 %s195_s7, 4  ;;  %s202_s6 = int_to_ptr.hbm [resolvable:$true] %s201_s6  ;;  %s204_s8 = int_to_ptr.vmem [resolvable:$true] %s203_s8 }
  0x1e   : > { %p944_p10 = pnand %p582_p5, %p38_p7  ;;  %s192_s10 = scalar_lea.sflag [#allocation3], %s191_s25 }
  0x1f   : > { %s720_s11 = sshra.s32 %s202_s6, 4  ;;  %s727_s27 = scalar_lea.hbm %s1023_s0, 8  ;;  %s721_s11 = int_to_ptr.hbm [resolvable:$true] %s720_s11 }
  0x20   : > { %s722_s12 = scalar_lea.hbm %s721_s11, 4  ;;  %p724_p11 = pneg %p944_p10 }
  0x21   : > { %p723_p2 = scmp.ne.s32.totalorder %s721_s11, %s722_s12  ;;  %p728_p0 = scmp.lt.s32.totalorder %s721_s11, %s1023_s0 }
  0x22   : > { %p729_p5 = scmp.lt.s32.totalorder %s727_s27, %s722_s12 }
  0x23   : > { %p725_p12 = pnand %p724_p11, %p723_p2 }
  0x24   : > { %p730_p7 = por %p729_p5, %p728_p0 }
  0x25   : > { %p726_p13 = pneg %p725_p12 }
  0x27   : > { %p731_p9 = pnand %p730_p7, %p726_p13 }
  0x29   : > { %734 = shalt.err (!%p731_p9)
}
  0x2a   : > { %574 = dma.hbm_to_vmem [thread:$0]  (!%p944_p10), %s202_s6, 64, %s204_s8, %s192_s10  }
  0x2b   : > { %212 = sbr.rel (%p905_p8) target bundleno = 887 (0x377), region = 36  ;;  %s961_s25 = sand.u32 (!%p905_p8), 1, %s816_s16  }
  0x2c   : > { %s530_s30 = sshll.u32 (!%p905_p8), %s961_s25, 2  ;;  %s215_s5 = scalar_lea.sflag (!%p905_p8), [#allocation3], %s961_s25 }
  0x2d   : > { %s218_s7 = scalar_lea.vmem (!%p905_p8), [#allocation2], %s530_s30 }
  0x30   : > { %795 = dma.done.wait (%p892_p4), %s215_s5, 64  }
  0x31   : > { %797 = vsyncadd (%p892_p4), %s215_s5, 4294967232 }
  0x32   : > { %799 = dma.done.wait (%p43_p1), [#allocation6], 256  }
  0x33   : > { %801 = vsyncadd (%p43_p1), [#allocation6], 4294967040 }
  0x34   : > { %803 = dma.done.wait (%p43_p1), [#allocation9], 128  }
  0x35   : > { %805 = vsyncadd (%p43_p1), [#allocation9], 4294967168  ;;  %v259_v0 = vld [vmem:[%s218_s7] sm:$0xf]  ;;  %s829_s26 = smov 116   ;;  %s830_s6 = smov 20  }
  0x36   : > { %262 = vrot.lane.b32.xlu0 %v259_v0, %s829_s26  ;;  %268 = vrot.lane.b32.xlu1 %v259_v0, %s830_s6  ;;  %s831_s8 = smov 4   ;;  %vm271_vm0 = vcmask 31744   ;;  %vm273_vm1 = vcmask 162816   ;;  %s832_s21 = smov 124   ;;  %vm290_vm2 = vcmask 1044480   ;;  %vm283_vm3 = vcmask 1043456  }
  0x37   : > { %s833_s9 = smov 126   ;;  %v260_v10 = vld [vmem:[#allocation5] sm:$0xff]  ;;  %vm286_vm4 = vcmask 105472   ;;  %s834_s10 = smov 24   ;;  %v365_v14 = vsel %vm283_vm3, %v259_v0, 1.0  ;;  %v366_v15 = vld [vmem:[#allocation8] sm:$0xff] }
  0x38   : > { %s835_s11 = smov 112   ;;  %vm367_vm5 = vcmask 39936   ;;  %539 = vmatpush.msk.msra.mxu2 %vm290_vm2, %v365_v14  ;;  %vm340_vm6 = vcmask 1040384   ;;  %v836_v16 = vmov 1.0   ;;  %vm327_vm7 = vcmask 195584   ;;  %v315_v25 = vld [vmem:[#allocation7] sm:$0xff] }
  0x39   : > { %540 = vmatmul.msk.f32.vlgmr.msra.gmra.mxu2 %vm367_vm5, %v366_v15  ;;  %537 = vmatpush.msk.msra.mxu1 %vm340_vm6, %v836_v16  ;;  %vm336_vm8 = vcmask 203776   ;;  %s534_s12 = sshll.u32 %s961_s25, 3  ;;  %s542_s14 = sshll.u32 %s883_s19, 3  ;;  %vm404_vm9 = vcmask 130048  }
  0x3a   : > { %s417_s28 = scalar_lea.hbm %s1027_s4, %s542_s14  ;;  %s258_s29 = scalar_lea.vmem [#allocation10], %s534_s12 }
  0x3b   : > { %s419_s30 = sshll.u32 %s258_s29, 4  ;;  %s421_s5 = sshll.u32 %s417_s28, 4  ;;  %s420_s30 = int_to_ptr.vmem [resolvable:$true] %s419_s30  ;;  %s422_s5 = int_to_ptr.hbm [resolvable:$true] %s421_s5 }
  0x3c   : > { %s407_s7 = scalar_lea.sflag [#allocation4], %s961_s25  ;;  %s764_s26 = sshra.s32 %s422_s5, 4  ;;  %s765_s26 = int_to_ptr.hbm [resolvable:$true] %s764_s26 }
  0x3d   : > { %s766_s6 = scalar_lea.hbm %s765_s26, 8  ;;  %p771_p9 = scmp.lt.s32.totalorder %s765_s26, %s1027_s4 }
  0x3e   : > { %265 = vrot.lane.b32.xlu0 %v259_v0, %s831_s8  ;;  %p767_p1 = scmp.ne.s32.totalorder %s765_s26, %s766_s6 }
  0x40   : > { %p768_p4 = pnand %p767_p1, %p934_p3 }
  0x42   : > { %p769_p8 = pneg %p768_p4 }
  0xa8   : > { %v263_v1 = vpop.permute.xlu0 %262  ;;  %v269_v2 = vpop.permute.xlu1 %268 }
  0xb0   : > { %v266_v3 = vpop.permute.xlu0 %265 }
  0xb1   : > { %v272_v4 = vsel %vm271_vm0, %v263_v1, %v266_v3 }
  0xb2   : > { %v274_v5 = vsel %vm273_vm1, %v272_v4, %v269_v2 }
  0xb3   : > { %280 = vrot.lane.b32.xlu1 %v274_v5, %s832_s21  ;;  %v276_v6 = vrot.slane %v274_v5, 4 }
  0xb5   : > { %277 = vrot.lane.b32.xlu2 %v276_v6, %s833_s9 }
  0xbc   : > { %v391_v23 = vpop.f32.mrf.mxu2 }
 0x10f   : > { %v278_v7 = vpop.permute.xlu2 %277 }
 0x110   : > { %v284_v11 = vsel %vm283_vm3, %v274_v5, %v278_v7 }
 0x125   : > { %v281_v8 = vpop.permute.xlu1 %280 }
 0x126   : > { %v285_v9 = vsel %vm283_vm3, %v281_v8, 1.0 }
 0x127   : > { %535 = vmatpush.msk.msra.mxu0 %vm290_vm2, %v285_v9 }
 0x129   : > { %309 = vmatpush.msra.mxu0 %v284_v11 }
 0x12a   : > { %536 = vmatmul.msk.f32.vlgmr.msra.gmra.mxu0 %vm286_vm4, %v260_v10 }
 0x1a7   : > { %v311_v12 = vpop.f32.mrf.mxu0 }
 0x1a8   : > { %v314_v13 = vmax.f32 %v311_v12, 0.0 }
 0x1aa   : > { %323 = vrot.lane.b32.xlu1 %v314_v13, %s834_s10  ;;  %320 = vrot.lane.b32.xlu0 %v314_v13, %s831_s8 }
 0x1ab   : > { %317 = vrot.lane.b32.xlu2 %v314_v13, %s835_s11 }
 0x1b2   : > { %395 = vrot.lane.b32.xlu1 %v391_v23, %s831_s8 }
 0x205   : > { %v318_v17 = vpop.permute.xlu2 %317 }
 0x21c   : > { %v324_v18 = vpop.permute.xlu1 %323  ;;  %v321_v19 = vpop.permute.xlu0 %320 }
 0x21d   : > { %v326_v20 = vsel %vm271_vm0, %v318_v17, %v321_v19 }
 0x21e   : > { %v328_v21 = vsel %vm327_vm7, %v326_v20, %v324_v18 }
 0x21f   : > { %330 = vrot.lane.b32.xlu0 %v328_v21, %s833_s9  ;;  %333 = vrot.lane.b32.xlu2 %v328_v21, %s832_s21 }
 0x224   : > { %v396_v27 = vpop.permute.xlu1 %395 }
 0x279   : > { %v334_v22 = vpop.permute.xlu2 %333 }
 0x27a   : > { %357 = vmatpush.msra.mxu1 %v334_v22 }
 0x291   : > { %v331_v24 = vpop.permute.xlu0 %330 }
 0x292   : > { %358 = vmatpush.msra.mxu1 %v331_v24 }
 0x294   : > { %359 = vmatpush.msra.mxu1 %v328_v21 }
 0x295   : > { %538 = vmatmul.msk.f32.vlgmr.msra.gmra.mxu1 %vm336_vm8, %v315_v25 }
 0x312   : > { %v361_v26 = vpop.f32.mrf.mxu1 }
 0x313   : > { %v364_v28 = vmax.f32 %v361_v26, 0.0 }
 0x315   : > { %v398_v29 = vadd.f32 %v396_v27, %v364_v28 }
 0x317   : > { %v399_v30 = vmax.f32 %v398_v29, 0.0 }
 0x319   : > { %401 = vrot.lane.b32.xlu2 %v399_v30, %s832_s21  ;;  %s770_s21 = scalar_lea.hbm %s1027_s4, 16 }
 0x31a   : > { %p772_p10 = scmp.lt.s32.totalorder %s770_s21, %s766_s6 }
 0x31c   : > { %p773_p2 = por %p772_p10, %p771_p9 }
 0x31e   : > { %p774_p11 = pnand %p773_p2, %p769_p8 }
 0x373   : > { %v402_v31 = vpop.permute.xlu2 %401 }
 0x374   : > { %405 = vst.msk [vmem:[%s258_s29] sm:$0xff] %vm404_vm9, %v402_v31 }
 0x375   : > { %777 = shalt.err (!%p774_p11)
}
 0x376   : > { %559 = dma.vmem_to_hbm [thread:$0]  (%p934_p3), %s420_s30, 128, %s422_s5, %s407_s7  }
 0x377 PF: > { %s433_s25 = sand.u32 1, %s812_s15   ;;  %p1033_p12 = scmp.ge.s32.totalorder %s824_s18, 2 }
 0x378   : > { %s434_s11 = scalar_lea.sflag [#allocation4], %s433_s25 }
 0x379   : > { %p576_p13 = pnand %p1033_p12, %p897_p6 }
 0x37b   : > { %p577_p0 = pneg %p576_p13 }
 0x37d   : > { %807 = dma.done.wait (%p577_p0), %s434_s11, 128  }
 0x37e   : > { %809 = vsyncadd (%p577_p0), %s434_s11, 4294967168  ;;  %p19_p5 = scmp.ge.s32.totalorder %s921_s13, 4   ;;  %s1034_s15 = smov %s816_s16 }
 0x37f   : > { %s1035_s16 = smov %s820_s17  ;;  %s1036_s17 = smov %s930_s23 }
 0x380   : > { %s1037_s18 = smov %s921_s13  ;;  %21 = sbr.rel (!%p19_p5) target bundleno = 7 (0x7), region = 93 }
 0x385   :  { %440 = vsyncpa [#allocation3], 1 }
 0x386   :  { %442 = vsyncpa [#allocation3 + $0x1], 1 }
 0x387   :  { %443 = vsyncpa [#allocation6], 1 }
 0x388   :  { %444 = vsyncpa [#allocation9], 1 }
 0x389   :  { %445 = vsyncpa [#allocation4], 1 }
 0x38a   :  { %447 = vsyncpa [#allocation4 + $0x1], 1 }

</bundles_post_ra>
